<compile_context>
chip_gen: v7x
topology: tpu7x:2x2x1
jax: 0.10.0
libtpu: 0.0.40
codegen_flags: <defaults>
</compile_context>

<pallas_src>
import functools

import jax
import jax.numpy as jnp
import numpy as np
from jax.experimental import pallas as pl
from jax.experimental.pallas import tpu as pltpu


def _gobal_pooling_kernel(x_ref, m_ref, w1_ref, b1_ref, wk_ref, b2_ref, s_ref,
                          o_ref, *, bN):
    # x_ref  : (bN, C, H*W)   lane-dense input block
    # m_ref  : (H*W, 4)       quadrant averaging matrix
    # w1_ref : (C, C)         1x1 conv weight (out, in)
    # b1_ref : (C, 1)         1x1 conv bias
    # wk_ref : (9, C, C)      transposed-conv weights per tap k=kh*3+kw, (out, in)
    # b2_ref : (C, 1)         transposed-conv bias
    # s_ref  : (36, SS)       0/1 additive scatter: row k*4+q -> flat output pos
    # o_ref  : (bN, C, SS)    lane-dense output block
    mm = m_ref[...]
    if x_ref.dtype != mm.dtype:
        mm = mm.astype(x_ref.dtype)          # keep bf16 inputs bf16 on the MXU
    w1 = w1_ref[...]
    b1 = b1_ref[...]
    wks = [wk_ref[k] for k in range(9)]      # hoist weight slabs out of the loop
    b2 = b2_ref[...]
    s = s_ref[...]

    for n in range(bN):
        xv = x_ref[n]                                                   # (C, HW)

        # ---- AdaptiveAvgPool2d(2) as one matmul (f32 accumulation) ----
        pooled = jnp.dot(xv, mm, preferred_element_type=jnp.float32)    # (C, 4)

        # ---- pointConv: 1x1 conv + ReLU ----
        y = jnp.dot(w1, pooled, preferred_element_type=jnp.float32) + b1
        y = jnp.maximum(y, 0.0)                                         # (C, 4)

        # ---- upSample: ConvTranspose2d taps, one matmul per kernel tap ----
        # tmat[:, k*4 + q] = sum_ci W2[ci, co, k] * y[ci, q]
        tmat = jnp.concatenate(
            [jnp.dot(wks[k], y, preferred_element_type=jnp.float32)
             for k in range(9)], axis=1)                                # (C, 36)

        # additive scatter to the flat output plane + bias + ReLU
        out = jnp.dot(tmat, s, preferred_element_type=jnp.float32) + b2  # (C, SS)
        o_ref[n] = jnp.maximum(out, 0.0).astype(o_ref.dtype)


def _pick_block_n(N):
    """Largest divisor of N (<=8) that still leaves >=2 grid steps when possible."""
    best = 1
    for d in range(1, min(N, 8) + 1):
        if N % d == 0 and (N // d >= 2 or N == 1):
            best = d
    return best


def gobal_pooling_pallas(x, w1, b1, w2, b2, size):
    """x: (N, C, H, W); w1: (C, C, 1, 1); b1: (C,);
       w2: (C, C, 3, 3) [in, out, kh, kw] (PyTorch ConvTranspose2d layout); b2: (C,)."""
    N, C, H, W = x.shape
    HW, SS = H * W, size * size
    stride = size - 1

    # ---- quadrant-averaging matrix (PyTorch adaptive-pool bin boundaries) ----
    Mnp = np.zeros((HW, 4), np.float32)
    for r in range(2):
        r0, r1 = (r * H) // 2, -((-(r + 1) * H) // 2)
        for c in range(2):
            c0, c1 = (c * W) // 2, -((-(c + 1) * W) // 2)
            inv = 1.0 / float((r1 - r0) * (c1 - c0))
            for hh in range(r0, r1):
                Mnp[hh * W + c0:hh * W + c1, 2 * r + c] = inv

    # ---- ConvTranspose 0/1 additive scatter matrix: (tap k, input pos q) -> flat out ----
    # row index = (kh*3+kw)*4 + (ih*2+iw); invalid (out-of-bounds) taps stay all-zero.
    Snp = np.zeros((36, SS), np.float32)
    for ih in range(2):
        for kh in range(3):
            oh = ih * stride + kh - 1
            if not (0 <= oh < size):
                continue
            for iw in range(2):
                for kw in range(3):
                    ow = iw * stride + kw - 1
                    if not (0 <= ow < size):
                        continue
                    Snp[(kh * 3 + kw) * 4 + (ih * 2 + iw), oh * size + ow] = 1.0

    # ---- weight / bias layout prep (matmul-ready) ----
    w1_mat = w1.reshape(C, C).astype(jnp.float32)                       # (out, in)
    wk = jnp.transpose(w2, (2, 3, 1, 0)).reshape(9, C, C).astype(jnp.float32)  # (k, out, in)
    b1_c = b1.reshape(C, 1).astype(jnp.float32)
    b2_c = b2.reshape(C, 1).astype(jnp.float32)

    x2 = x.reshape(N, C, HW)                                            # lane-dense
    bN = _pick_block_n(N)
    grid = (N // bN,)

    kernel = functools.partial(_gobal_pooling_kernel, bN=bN)
    out_flat = pl.pallas_call(
        kernel,
        out_shape=jax.ShapeDtypeStruct((N, C, SS), x.dtype),
        grid=grid,
        in_specs=[
            pl.BlockSpec((bN, C, HW), lambda g: (g, 0, 0)),
            pl.BlockSpec((HW, 4), lambda g: (0, 0)),
            pl.BlockSpec((C, C), lambda g: (0, 0)),
            pl.BlockSpec((C, 1), lambda g: (0, 0)),
            pl.BlockSpec((9, C, C), lambda g: (0, 0, 0)),
            pl.BlockSpec((C, 1), lambda g: (0, 0)),
            pl.BlockSpec((36, SS), lambda g: (0, 0)),
        ],
        out_specs=pl.BlockSpec((bN, C, SS), lambda g: (g, 0, 0)),
        compiler_params=pltpu.CompilerParams(dimension_semantics=("parallel",)),
    )(x2, jnp.asarray(Mnp), w1_mat, b1_c, wk, b2_c, jnp.asarray(Snp))
    return out_flat.reshape(N, C, size, size)


def gobal_pooling_ref(x, w1, b1, w2, b2, size):
    """Pure-JAX reference matching PyTorch semantics."""
    N, C, H, W = x.shape
    h0e, h1s = -(-H // 2), H // 2
    w0e, w1s = -(-W // 2), W // 2
    q = lambda t: jnp.mean(t, axis=(2, 3))
    pooled = jnp.stack([
        jnp.stack([q(x[:, :, :h0e, :w0e]), q(x[:, :, :h0e, w1s:])], axis=-1),
        jnp.stack([q(x[:, :, h1s:, :w0e]), q(x[:, :, h1s:, w1s:])], axis=-1),
    ], axis=-2)                                           # (N, C, 2, 2)
    y = jnp.einsum('oc,nchw->nohw', w1.reshape(C, C), pooled) + b1[None, :, None, None]
    y = jnp.maximum(y, 0.0)
    stride = size - 1
    # ConvTranspose2d == dilated conv with spatially flipped, (in,out)-swapped weights
    w_t = jnp.flip(jnp.transpose(w2, (1, 0, 2, 3)), axis=(2, 3))  # (out, in, 3, 3)
    out = jax.lax.conv_general_dilated(
        y, w_t, window_strides=(1, 1), padding=[(1, 1), (1, 1)],
        lhs_dilation=(stride, stride),
        dimension_numbers=('NCHW', 'OIHW', 'NCHW'))
    out = out + b2[None, :, None, None]
    return jnp.maximum(out, 0.0)


if __name__ == "__main__":
    N, C, H, W = 2, 4, 16, 16
    size = 16  # ConvTranspose2d(k=3, pad=1, stride=size-1) maps 2x2 -> size x size

    key = jax.random.PRNGKey(0)
    k1, k2, k3, k4, k5 = jax.random.split(key, 5)
    x = jax.random.normal(k5, (N, C, H, W), jnp.float32)
    w1 = jax.random.normal(k1, (C, C, 1, 1), jnp.float32) * 0.3   # Conv2d(C, C, 1)
    b1 = jax.random.normal(k2, (C,), jnp.float32) * 0.1
    w2 = jax.random.normal(k3, (C, C, 3, 3), jnp.float32) * 0.3   # ConvTranspose2d(C, C, 3)
    b2 = jax.random.normal(k4, (C,), jnp.float32) * 0.1

    out = gobal_pooling_pallas(x, w1, b1, w2, b2, size)
    out = jax.block_until_ready(out)

    ref = jax.block_until_ready(gobal_pooling_ref(x, w1, b1, w2, b2, size))
    assert out.shape == (N, C, size, size), out.shape
    np.testing.assert_allclose(np.asarray(out), np.asarray(ref), rtol=1e-4, atol=1e-4)

    print("KERNEL_OK")
</pallas_src>

<mosaic_0001>
module attributes {stable_mosaic.version = 11 : i64} {
  func.func @_gobal_pooling_kernel(%arg0: i32, %arg1: memref<1x4x256xf32, #tpu.memory_space<vmem>>, %arg2: memref<256x4xf32, #tpu.memory_space<vmem>>, %arg3: memref<4x4xf32, #tpu.memory_space<vmem>>, %arg4: memref<4x1xf32, #tpu.memory_space<vmem>>, %arg5: memref<9x4x4xf32, #tpu.memory_space<vmem>>, %arg6: memref<4x1xf32, #tpu.memory_space<vmem>>, %arg7: memref<36x256xf32, #tpu.memory_space<vmem>>, %arg8: memref<1x4x256xf32, #tpu.memory_space<vmem>>) attributes {dimension_semantics = [#tpu.dimension_semantics<parallel>], iteration_bounds = array<i64: 2>, scalar_prefetch = 0 : i64, scratch_operands = 0 : i64, tpu.core_type = #tpu.core_type<tc>, window_params = [{transform_indices = @transform_0, window_bounds = array<i64: 1, 4, 256>}, {pipeline_mode = #tpu.pipeline_mode<synchronous>, transform_indices = @transform_1, window_bounds = array<i64: 256, 4>}, {pipeline_mode = #tpu.pipeline_mode<synchronous>, transform_indices = @transform_2, window_bounds = array<i64: 4, 4>}, {pipeline_mode = #tpu.pipeline_mode<synchronous>, transform_indices = @transform_3, window_bounds = array<i64: 4, 1>}, {pipeline_mode = #tpu.pipeline_mode<synchronous>, transform_indices = @transform_4, window_bounds = array<i64: 9, 4, 4>}, {pipeline_mode = #tpu.pipeline_mode<synchronous>, transform_indices = @transform_5, window_bounds = array<i64: 4, 1>}, {pipeline_mode = #tpu.pipeline_mode<synchronous>, transform_indices = @transform_6, window_bounds = array<i64: 36, 256>}, {transform_indices = @transform_7, window_bounds = array<i64: 1, 4, 256>}]} {
    %c0 = arith.constant 0 : index
    %c0_0 = arith.constant 0 : index
    %0 = vector.load %arg2[%c0, %c0_0] : memref<256x4xf32, #tpu.memory_space<vmem>>, vector<256x4xf32>
    %c0_1 = arith.constant 0 : index
    %c0_2 = arith.constant 0 : index
    %1 = vector.load %arg3[%c0_1, %c0_2] : memref<4x4xf32, #tpu.memory_space<vmem>>, vector<4x4xf32>
    %c0_3 = arith.constant 0 : index
    %c0_4 = arith.constant 0 : index
    %2 = vector.load %arg4[%c0_3, %c0_4] : memref<4x1xf32, #tpu.memory_space<vmem>>, vector<4x1xf32>
    %c0_5 = arith.constant 0 : index
    %c0_6 = arith.constant 0 : index
    %c0_7 = arith.constant 0 : index
    %3 = vector.load %arg5[%c0_5, %c0_6, %c0_7] : memref<9x4x4xf32, #tpu.memory_space<vmem>>, vector<1x4x4xf32>
    %4 = vector.shape_cast %3 : vector<1x4x4xf32> to vector<4x4xf32>
    %c1 = arith.constant 1 : index
    %c0_8 = arith.constant 0 : index
    %c0_9 = arith.constant 0 : index
    %5 = vector.load %arg5[%c1, %c0_8, %c0_9] : memref<9x4x4xf32, #tpu.memory_space<vmem>>, vector<1x4x4xf32>
    %6 = vector.shape_cast %5 : vector<1x4x4xf32> to vector<4x4xf32>
    %c2 = arith.constant 2 : index
    %c0_10 = arith.constant 0 : index
    %c0_11 = arith.constant 0 : index
    %7 = vector.load %arg5[%c2, %c0_10, %c0_11] : memref<9x4x4xf32, #tpu.memory_space<vmem>>, vector<1x4x4xf32>
    %8 = vector.shape_cast %7 : vector<1x4x4xf32> to vector<4x4xf32>
    %c3 = arith.constant 3 : index
    %c0_12 = arith.constant 0 : index
    %c0_13 = arith.constant 0 : index
    %9 = vector.load %arg5[%c3, %c0_12, %c0_13] : memref<9x4x4xf32, #tpu.memory_space<vmem>>, vector<1x4x4xf32>
    %10 = vector.shape_cast %9 : vector<1x4x4xf32> to vector<4x4xf32>
    %c4 = arith.constant 4 : index
    %c0_14 = arith.constant 0 : index
    %c0_15 = arith.constant 0 : index
    %11 = vector.load %arg5[%c4, %c0_14, %c0_15] : memref<9x4x4xf32, #tpu.memory_space<vmem>>, vector<1x4x4xf32>
    %12 = vector.shape_cast %11 : vector<1x4x4xf32> to vector<4x4xf32>
    %c5 = arith.constant 5 : index
    %c0_16 = arith.constant 0 : index
    %c0_17 = arith.constant 0 : index
    %13 = vector.load %arg5[%c5, %c0_16, %c0_17] : memref<9x4x4xf32, #tpu.memory_space<vmem>>, vector<1x4x4xf32>
    %14 = vector.shape_cast %13 : vector<1x4x4xf32> to vector<4x4xf32>
    %c6 = arith.constant 6 : index
    %c0_18 = arith.constant 0 : index
    %c0_19 = arith.constant 0 : index
    %15 = vector.load %arg5[%c6, %c0_18, %c0_19] : memref<9x4x4xf32, #tpu.memory_space<vmem>>, vector<1x4x4xf32>
    %16 = vector.shape_cast %15 : vector<1x4x4xf32> to vector<4x4xf32>
    %c7 = arith.constant 7 : index
    %c0_20 = arith.constant 0 : index
    %c0_21 = arith.constant 0 : index
    %17 = vector.load %arg5[%c7, %c0_20, %c0_21] : memref<9x4x4xf32, #tpu.memory_space<vmem>>, vector<1x4x4xf32>
    %18 = vector.shape_cast %17 : vector<1x4x4xf32> to vector<4x4xf32>
    %c8 = arith.constant 8 : index
    %c0_22 = arith.constant 0 : index
    %c0_23 = arith.constant 0 : index
    %19 = vector.load %arg5[%c8, %c0_22, %c0_23] : memref<9x4x4xf32, #tpu.memory_space<vmem>>, vector<1x4x4xf32>
    %20 = vector.shape_cast %19 : vector<1x4x4xf32> to vector<4x4xf32>
    %c0_24 = arith.constant 0 : index
    %c0_25 = arith.constant 0 : index
    %21 = vector.load %arg6[%c0_24, %c0_25] : memref<4x1xf32, #tpu.memory_space<vmem>>, vector<4x1xf32>
    %c0_26 = arith.constant 0 : index
    %c0_27 = arith.constant 0 : index
    %22 = vector.load %arg7[%c0_26, %c0_27] : memref<36x256xf32, #tpu.memory_space<vmem>>, vector<36x256xf32>
    %c0_28 = arith.constant 0 : index
    %c0_29 = arith.constant 0 : index
    %c0_30 = arith.constant 0 : index
    %23 = vector.load %arg1[%c0_28, %c0_29, %c0_30] : memref<1x4x256xf32, #tpu.memory_space<vmem>>, vector<1x4x256xf32>
    %24 = vector.shape_cast %23 : vector<1x4x256xf32> to vector<4x256xf32>
    %cst = arith.constant dense<0.000000e+00> : vector<4x4xf32>
    %25 = tpu.matmul %24, %0, %cst {dimension_numbers = #tpu.dot_dimension_numbers<[1], [0], [0], [1], [0, 0, 1, 1], [], []>} : vector<4x256xf32>, vector<256x4xf32>, vector<4x4xf32> -> vector<4x4xf32>
    %cst_31 = arith.constant dense<0.000000e+00> : vector<4x4xf32>
    %26 = tpu.matmul %1, %25, %cst_31 {dimension_numbers = #tpu.dot_dimension_numbers<[1], [0], [0], [1], [0, 0, 1, 1], [], []>} : vector<4x4xf32>, vector<4x4xf32>, vector<4x4xf32> -> vector<4x4xf32>
    %27 = vector.broadcast %2 : vector<4x1xf32> to vector<4x4xf32>
    %28 = arith.addf %26, %27 : vector<4x4xf32>
    %cst_32 = arith.constant 0.000000e+00 : f32
    %29 = vector.broadcast %cst_32 : f32 to vector<4x4xf32>
    %30 = arith.maximumf %28, %29 : vector<4x4xf32>
    %cst_33 = arith.constant dense<0.000000e+00> : vector<4x4xf32>
    %31 = tpu.matmul %4, %30, %cst_33 {dimension_numbers = #tpu.dot_dimension_numbers<[1], [0], [0], [1], [0, 0, 1, 1], [], []>} : vector<4x4xf32>, vector<4x4xf32>, vector<4x4xf32> -> vector<4x4xf32>
    %cst_34 = arith.constant dense<0.000000e+00> : vector<4x4xf32>
    %32 = tpu.matmul %6, %30, %cst_34 {dimension_numbers = #tpu.dot_dimension_numbers<[1], [0], [0], [1], [0, 0, 1, 1], [], []>} : vector<4x4xf32>, vector<4x4xf32>, vector<4x4xf32> -> vector<4x4xf32>
    %cst_35 = arith.constant dense<0.000000e+00> : vector<4x4xf32>
    %33 = tpu.matmul %8, %30, %cst_35 {dimension_numbers = #tpu.dot_dimension_numbers<[1], [0], [0], [1], [0, 0, 1, 1], [], []>} : vector<4x4xf32>, vector<4x4xf32>, vector<4x4xf32> -> vector<4x4xf32>
    %cst_36 = arith.constant dense<0.000000e+00> : vector<4x4xf32>
    %34 = tpu.matmul %10, %30, %cst_36 {dimension_numbers = #tpu.dot_dimension_numbers<[1], [0], [0], [1], [0, 0, 1, 1], [], []>} : vector<4x4xf32>, vector<4x4xf32>, vector<4x4xf32> -> vector<4x4xf32>
    %cst_37 = arith.constant dense<0.000000e+00> : vector<4x4xf32>
    %35 = tpu.matmul %12, %30, %cst_37 {dimension_numbers = #tpu.dot_dimension_numbers<[1], [0], [0], [1], [0, 0, 1, 1], [], []>} : vector<4x4xf32>, vector<4x4xf32>, vector<4x4xf32> -> vector<4x4xf32>
    %cst_38 = arith.constant dense<0.000000e+00> : vector<4x4xf32>
    %36 = tpu.matmul %14, %30, %cst_38 {dimension_numbers = #tpu.dot_dimension_numbers<[1], [0], [0], [1], [0, 0, 1, 1], [], []>} : vector<4x4xf32>, vector<4x4xf32>, vector<4x4xf32> -> vector<4x4xf32>
    %cst_39 = arith.constant dense<0.000000e+00> : vector<4x4xf32>
    %37 = tpu.matmul %16, %30, %cst_39 {dimension_numbers = #tpu.dot_dimension_numbers<[1], [0], [0], [1], [0, 0, 1, 1], [], []>} : vector<4x4xf32>, vector<4x4xf32>, vector<4x4xf32> -> vector<4x4xf32>
    %cst_40 = arith.constant dense<0.000000e+00> : vector<4x4xf32>
    %38 = tpu.matmul %18, %30, %cst_40 {dimension_numbers = #tpu.dot_dimension_numbers<[1], [0], [0], [1], [0, 0, 1, 1], [], []>} : vector<4x4xf32>, vector<4x4xf32>, vector<4x4xf32> -> vector<4x4xf32>
    %cst_41 = arith.constant dense<0.000000e+00> : vector<4x4xf32>
    %39 = tpu.matmul %20, %30, %cst_41 {dimension_numbers = #tpu.dot_dimension_numbers<[1], [0], [0], [1], [0, 0, 1, 1], [], []>} : vector<4x4xf32>, vector<4x4xf32>, vector<4x4xf32> -> vector<4x4xf32>
    %40 = tpu.concatenate %31, %32, %33, %34, %35, %36, %37, %38, %39 in 1 : vector<4x4xf32>, vector<4x4xf32>, vector<4x4xf32>, vector<4x4xf32>, vector<4x4xf32>, vector<4x4xf32>, vector<4x4xf32>, vector<4x4xf32>, vector<4x4xf32> -> vector<4x36xf32>
    %cst_42 = arith.constant dense<0.000000e+00> : vector<4x256xf32>
    %41 = tpu.matmul %40, %22, %cst_42 {dimension_numbers = #tpu.dot_dimension_numbers<[1], [0], [0], [1], [0, 0, 1, 1], [], []>} : vector<4x36xf32>, vector<36x256xf32>, vector<4x256xf32> -> vector<4x256xf32>
    %42 = vector.broadcast %21 : vector<4x1xf32> to vector<4x256xf32>
    %43 = arith.addf %41, %42 : vector<4x256xf32>
    %cst_43 = arith.constant 0.000000e+00 : f32
    %44 = vector.broadcast %cst_43 : f32 to vector<4x256xf32>
    %45 = arith.maximumf %43, %44 : vector<4x256xf32>
    %c0_44 = arith.constant 0 : index
    %c0_45 = arith.constant 0 : index
    %c0_46 = arith.constant 0 : index
    %46 = vector.load %arg8[%c0_44, %c0_45, %c0_46] : memref<1x4x256xf32, #tpu.memory_space<vmem>>, vector<1x4x256xf32>
    %47 = vector.shape_cast %46 : vector<1x4x256xf32> to vector<4x256xf32>
    %48 = vector.shape_cast %45 : vector<4x256xf32> to vector<1x4x256xf32>
    tpu.vector_store %arg8[%c0_44, %c0_45, %c0_46], %48 {strides = array<i32>} : memref<1x4x256xf32, #tpu.memory_space<vmem>>, vector<1x4x256xf32>,
    return
  }
  func.func @transform_0(%arg0: i32) -> (i32, i32, i32) {
    %c0_i32 = arith.constant 0 : i32
    %c0_i32_0 = arith.constant 0 : i32
    %c0_i32_1 = arith.constant 0 : i32
    return %arg0, %c0_i32, %c0_i32_0 : i32, i32, i32
  }
  func.func @transform_1(%arg0: i32) -> (i32, i32) {
    %c0_i32 = arith.constant 0 : i32
    %c0_i32_0 = arith.constant 0 : i32
    %c0_i32_1 = arith.constant 0 : i32
    return %c0_i32, %c0_i32_0 : i32, i32
  }
  func.func @transform_2(%arg0: i32) -> (i32, i32) {
    %c0_i32 = arith.constant 0 : i32
    %c0_i32_0 = arith.constant 0 : i32
    %c0_i32_1 = arith.constant 0 : i32
    return %c0_i32, %c0_i32_0 : i32, i32
  }
  func.func @transform_3(%arg0: i32) -> (i32, i32) {
    %c0_i32 = arith.constant 0 : i32
    %c0_i32_0 = arith.constant 0 : i32
    %c0_i32_1 = arith.constant 0 : i32
    return %c0_i32, %c0_i32_0 : i32, i32
  }
  func.func @transform_4(%arg0: i32) -> (i32, i32, i32) {
    %c0_i32 = arith.constant 0 : i32
    %c0_i32_0 = arith.constant 0 : i32
    %c0_i32_1 = arith.constant 0 : i32
    %c0_i32_2 = arith.constant 0 : i32
    return %c0_i32, %c0_i32_0, %c0_i32_1 : i32, i32, i32
  }
  func.func @transform_5(%arg0: i32) -> (i32, i32) {
    %c0_i32 = arith.constant 0 : i32
    %c0_i32_0 = arith.constant 0 : i32
    %c0_i32_1 = arith.constant 0 : i32
    return %c0_i32, %c0_i32_0 : i32, i32
  }
  func.func @transform_6(%arg0: i32) -> (i32, i32) {
    %c0_i32 = arith.constant 0 : i32
    %c0_i32_0 = arith.constant 0 : i32
    %c0_i32_1 = arith.constant 0 : i32
    return %c0_i32, %c0_i32_0 : i32, i32
  }
  func.func @transform_7(%arg0: i32) -> (i32, i32, i32) {
    %c0_i32 = arith.constant 0 : i32
    %c0_i32_0 = arith.constant 0 : i32
    %c0_i32_1 = arith.constant 0 : i32
    return %arg0, %c0_i32, %c0_i32_0 : i32, i32, i32
  }
}

</mosaic_0001>

<bundles_post_ra>
// kernel: tpu_custom_call.1
= control target key start
LH: loop header
LB: loop body
LE: loop exit
PB: predicated region body
PF: predicated region fallthrough
CT: control target
= control target key end

     0   :  { %12 = vsyncpa [#allocation3], 0  ;;  %s2049_s0 = inlined_call_operand.vmem [shape: f32[2,4,256], index: 0, kind: input, shape index: {}]   ;;  %s2050_s1 = inlined_call_operand.vmem [shape: f32[256,4], index: 1, kind: input, shape index: {}]   ;;  %s2051_s2 = inlined_call_operand.vmem [shape: f32[4,4], index: 2, kind: input, shape index: {}]   ;;  %s2052_s3 = inlined_call_operand.vmem [shape: f32[4,1], index: 3, kind: input, shape index: {}]   ;;  %s2053_s4 = inlined_call_operand.vmem [shape: f32[9,4,4], index: 4, kind: input, shape index: {}]   ;;  %s2054_s5 = inlined_call_operand.vmem [shape: f32[4,1], index: 5, kind: input, shape index: {}]   ;;  %s2055_s6 = inlined_call_operand.vmem [shape: f32[36,256], index: 6, kind: input, shape index: {}]   ;;  %s2056_s7 = inlined_call_operand.hbm [shape: f32[2,4,256], index: 7, kind: output, shape index: {}]  }
   0x1   :  { %14 = vsyncpa [#allocation3 + $0x1], 0  ;;  %s1730_s24 = smov 0   ;;  %s1732_s25 = smov 0  }
   0x2   :  { %s1734_s26 = smov 0   ;;  %s1736_s27 = smov 0  }
   0x3 LB: > { %s1751_s28 = sadd.s32 4294967295, %s1676_s27   ;;  %s1371_s29 = sadd.s32 4294967294, %s1676_s27   ;;  %s1676_s27 = sphi %s1736_s27, %s2062_s27   ;;  %s1672_s26 = sphi %s1734_s26, %s2061_s26   ;;  %s1668_s25 = sphi %s1732_s25, %s2060_s25   ;;  %s1664_s24 = sphi %s1730_s24, %s2059_s24  }
   0x4   : > { %s1755_s30 = sadd.s32 1, %s1676_s27   ;;  %s179_s8 = sadd.s32 1, %s1672_s26 }
   0x5   : > { %s176_s9 = ssub.s32 %s1676_s27, %s1755_s30  ;;  %p189_p0 = scmp.ne.s32.totalorder %s1672_s26, %s1668_s25 }
   0x6   : > { %p177_p1 = scmp.eq.s32.totalorder %s176_s9, 0  ;;  %p190_p2 = scmp.eq.s32.totalorder %s1751_s28, 1 }
   0x7   : > { %p195_p3 = scmp.ne.s32.totalorder %s1668_s25, %s1664_s24  ;;  %p196_p4 = scmp.eq.s32.totalorder %s1371_s29, 1 }
   0x8   : > { %s1766_s10 = scalar_select %p177_p1, %s1672_s26, %s179_s8  }
   0x9   : > { %p1768_p5 = por %p190_p2, %p189_p0  ;;  %p1772_p6 = por %p196_p4, %p195_p3 }
   0xa   : > { %p1374_p7 = scmp.ge.s32.totalorder %s1676_s27, 1  ;;  %p240_p8 = scmp.lt.s32.totalorder %s1676_s27, 3 }
   0xc   : > { %p241_p9 = pnand %p1374_p7, %p240_p8 }
   0xd   : > { %v293_v0 = vld [vmem:[%s2050_s1 + $0x80] sm:$0xff] (!%p241_p9)  ;;  %v294_v1 = vld [vmem:[%s2050_s1 + $0x88] sm:$0xff] (!%p241_p9)  ;;  %p272_p10 = scmp.lt.s32.totalorder (!%p241_p9), %s1751_s28, 1  ;;  %v295_v5 = vld [vmem:[%s2050_s1 + $0x90] sm:$0xff] (!%p241_p9)  ;;  %v1678_v50 = vmov (!%p241_p9), 0.0   ;;  %vm1679_vm0 = vmmov (!%p241_p9), 0  }
   0xe   : > { %244 = sbr.rel (%p241_p9) target bundleno = 1071 (0x42f), region = 48  ;;  %v277_v2 = vld [vmem:[%s2050_s1] sm:$0xff] (!%p241_p9)  ;;  %v1521_v3 = vpack.c.bf16 (!%p241_p9), %v294_v1, %v293_v0  ;;  %v278_v4 = vld [vmem:[%s2050_s1 + $0x8] sm:$0xff] (!%p241_p9)  ;;  %v296_v6 = vld [vmem:[%s2050_s1 + $0x98] sm:$0xff] (!%p241_p9)  ;;  %1476 = vmatprep.subr.mxu1 (!%p241_p9), %v1678_v50  ;;  %1478 = vmatprep.mubr.msk.f32.mxu1 (!%p241_p9), %vm1679_vm0, %v1678_v50  ;;  %v1680_v52 = vmov (!%p241_p9), 0   ;;  %vm422_vm1 = vcmask (!%p241_p9), 1043456  }
   0xf   : > { %v1523_v7 = vpack.c.bf16 (!%p241_p9), %v278_v4, %v277_v2  ;;  %v1525_v8 = vpack.c.bf16 (!%p241_p9), %v296_v6, %v295_v5  ;;  %v279_v9 = vld [vmem:[%s2050_s1 + $0x10] sm:$0xff] (!%p241_p9)  ;;  %v280_v10 = vld [vmem:[%s2050_s1 + $0x18] sm:$0xff] (!%p241_p9)  ;;  %v297_v11 = vld [vmem:[%s2050_s1 + $0xa0] sm:$0xff] (!%p241_p9)  ;;  %1611 = vset.pattern.permute.xlu0 (!%p241_p9), %v1680_v52  ;;  %1612 = vset.pattern.permute.xlu1 (!%p241_p9), %v1680_v52  ;;  %vm418_vm2 = vcmask (!%p241_p9), 31744   ;;  %s1681_s21 = smov (!%p241_p9), 4   ;;  %s1682_s15 = smov (!%p241_p9), 8  }
  0x10   : > { %1522 = vmatprep.subr.bf16.mxu0 (!%p241_p9), %v1521_v3  ;;  %v298_v12 = vld [vmem:[%s2050_s1 + $0xa8] sm:$0xff] (!%p241_p9)  ;;  %v1527_v13 = vpack.c.bf16 (!%p241_p9), %v280_v10, %v279_v9  ;;  %v281_v15 = vld [vmem:[%s2050_s1 + $0x20] sm:$0xff] (!%p241_p9)  ;;  %v299_v17 = vld [vmem:[%s2050_s1 + $0xb0] sm:$0xff] (!%p241_p9)  ;;  %s1683_s8 = smov (!%p241_p9), 12   ;;  %s1684_s13 = smov (!%p241_p9), 16   ;;  %vm1190_vm3 = vcmask (!%p241_p9), 64512  }
  0x11   : > { %1524 = vmatpush3.bf16.msra.mxu0 (!%p241_p9), %v1523_v7  ;;  %v1529_v14 = vpack.c.bf16 (!%p241_p9), %v298_v12, %v297_v11  ;;  %v282_v16 = vld [vmem:[%s2050_s1 + $0x28] sm:$0xff] (!%p241_p9)  ;;  %v300_v18 = vld [vmem:[%s2050_s1 + $0xb8] sm:$0xff] (!%p241_p9)  ;;  %v283_v21 = vld [vmem:[%s2050_s1 + $0x30] sm:$0xff] (!%p241_p9)  ;;  %s1685_s16 = smov (!%p241_p9), 20   ;;  %s1686_s18 = smov (!%p241_p9), 24   ;;  %vm1192_vm4 = vcmask (!%p241_p9), 97280  }
  0x12   : > { %1526 = vmatprep.subr.bf16.mxu0 (!%p241_p9), %v1525_v8  ;;  %v1531_v19 = vpack.c.bf16 (!%p241_p9), %v282_v16, %v281_v15  ;;  %v1533_v20 = vpack.c.bf16 (!%p241_p9), %v300_v18, %v299_v17  ;;  %v284_v22 = vld [vmem:[%s2050_s1 + $0x38] sm:$0xff] (!%p241_p9)  ;;  %v301_v23 = vld [vmem:[%s2050_s1 + $0xc0] sm:$0xff] (!%p241_p9)  ;;  %v302_v24 = vld [vmem:[%s2050_s1 + $0xc8] sm:$0xff] (!%p241_p9)  ;;  %s1687_s19 = smov (!%p241_p9), 28   ;;  %vm1194_vm5 = vcmask (!%p241_p9), 130048   ;;  %vm1196_vm6 = vcmask (!%p241_p9), 162816  }
  0x13   : > { %v1535_v27 = vpack.c.bf16 (!%p241_p9), %v284_v22, %v283_v21  ;;  %v1537_v28 = vpack.c.bf16 (!%p241_p9), %v302_v24, %v301_v23  ;;  %v285_v29 = vld [vmem:[%s2050_s1 + $0x40] sm:$0xff] (!%p241_p9)  ;;  %v286_v30 = vld [vmem:[%s2050_s1 + $0x48] sm:$0xff] (!%p241_p9)  ;;  %v303_v31 = vld [vmem:[%s2050_s1 + $0xd0] sm:$0xff] (!%p241_p9)  ;;  %vm1198_vm7 = vcmask (!%p241_p9), 195584   ;;  %vm1200_vm8 = vcmask (!%p241_p9), 228352   ;;  %s269_s23 = sand.u32 (!%p241_p9), 1, %s1668_s25  }
  0x14   : > { %v304_v32 = vld [vmem:[%s2050_s1 + $0xd8] sm:$0xff] (!%p241_p9)  ;;  %v1539_v33 = vpack.c.bf16 (!%p241_p9), %v286_v30, %v285_v29  ;;  %v287_v35 = vld [vmem:[%s2050_s1 + $0x50] sm:$0xff] (!%p241_p9)  ;;  %v305_v37 = vld [vmem:[%s2050_s1 + $0xe0] sm:$0xff] (!%p241_p9)  ;;  %vm1202_vm9 = vcmask (!%p241_p9), 261120   ;;  %vm1209_vm10 = vcmask (!%p241_p9), 293888   ;;  %s1375_s29 = sshll.u32 (!%p241_p9), %s269_s23, 3 }
  0x15   : > { %s273_s17 = scalar_select %p272_p10, %s1751_s28, 1  ;;  %1528 = vmatpush3.bf16.msra.mxu0 %v1527_v13  ;;  %v1541_v34 = vpack.c.bf16 %v304_v32, %v303_v31  ;;  %v288_v36 = vld [vmem:[%s2050_s1 + $0x58] sm:$0xff]  ;;  %v306_v38 = vld [vmem:[%s2050_s1 + $0xe8] sm:$0xff]  ;;  %v289_v41 = vld [vmem:[%s2050_s1 + $0x60] sm:$0xff] }
  0x16   : > { %1530 = vmatprep.subr.bf16.mxu0 %v1529_v14  ;;  %v1543_v39 = vpack.c.bf16 %v288_v36, %v287_v35  ;;  %v1545_v40 = vpack.c.bf16 %v306_v38, %v305_v37  ;;  %v290_v42 = vld [vmem:[%s2050_s1 + $0x68] sm:$0xff]  ;;  %v307_v43 = vld [vmem:[%s2050_s1 + $0xf0] sm:$0xff]  ;;  %v308_v44 = vld [vmem:[%s2050_s1 + $0xf8] sm:$0xff]  ;;  %s271_s9 = scalar_lea.vmem [#allocation2], %s1375_s29 }
  0x17   : > { %s1414_s20 = sshll.u32 %s273_s17, 3  ;;  %v1547_v45 = vpack.c.bf16 %v290_v42, %v289_v41  ;;  %v1549_v46 = vpack.c.bf16 %v308_v44, %v307_v43  ;;  %v291_v47 = vld [vmem:[%s2050_s1 + $0x70] sm:$0xff]  ;;  %v292_v48 = vld [vmem:[%s2050_s1 + $0x78] sm:$0xff]  ;;  %v310_v51 = vld [vmem:[%s2052_s3] sm:$0xf] }
  0x18   : > { %s276_s17 = scalar_lea.vmem %s2049_s0, %s1414_s20  ;;  %v1551_v49 = vpack.c.bf16 %v292_v48, %v291_v47  ;;  %415 = vperm.xlu0 %1611, %v310_v51   ;;  %v309_v56 = vld [vmem:[%s2051_s2] sm:$0xf]  ;;  %v1378_v0 = vld [vmem:[%s2053_s4 + $0x4] sm:$0xf]  ;;  %v1379_v1 = vld [vmem:[%s2053_s4 + $0x8] sm:$0xf] }
  0x19   : > { %v339_v25 = vld [vmem:[%s276_s17] sm:$0xff]  ;;  %1532 = vmatpush3.bf16.msra.mxu0 %v1531_v19  ;;  %v1380_v2 = vld [vmem:[%s2053_s4 + $0xc] sm:$0xf]  ;;  %v1381_v3 = vld [vmem:[%s2053_s4 + $0x10] sm:$0xf]  ;;  %s1688_s17 = smov 32  }
  0x1a   : > { %v341_v26 = vcombine.high %v339_v25, %v339_v25  ;;  %1534 = vmatprep.subr.bf16.mxu0 %v1533_v20  ;;  %v311_v62 = vld [vmem:[%s2053_s4] sm:$0xf]  ;;  %v1382_v4 = vld [vmem:[%s2053_s4 + $0x14] sm:$0xf]  ;;  %v1383_v5 = vld [vmem:[%s2053_s4 + $0x18] sm:$0xf] }
  0x1b   : > { %v1385_v63 = vld [vmem:[%s2053_s4 + $0x20] sm:$0xf]  ;;  %v1384_v6 = vld [vmem:[%s2053_s4 + $0x1c] sm:$0xf]  ;;  %v330_v13 = vld [vmem:[%s2055_s6 + $0x8] sm:$0xff]  ;;  %s1312_s20 = sshll.u32 %s271_s9, 4  ;;  %s2009_s20 = int_to_ptr.vmem [resolvable:$true] %s1312_s20 }
  0x1c   : > { %407 = vmatprep.mubr.f32.mxu0 %v341_v26  ;;  %v332_v14 = vld [vmem:[%s2055_s6 + $0x18] sm:$0xff]  ;;  %v329_v16 = vld [vmem:[%s2055_s6] sm:$0xff]  ;;  %v331_v17 = vld [vmem:[%s2055_s6 + $0x10] sm:$0xff] }
  0x1d   : > { %1536 = vmatpush3.bf16.msra.mxu0 %v1535_v27  ;;  %v1553_v15 = vpack.c.bf16 %v332_v14, %v330_v13  ;;  %v1555_v19 = vpack.c.bf16 %v331_v17, %v329_v16  ;;  %v334_v21 = vld [vmem:[%s2055_s6 + $0x28] sm:$0xff]  ;;  %v336_v22 = vld [vmem:[%s2055_s6 + $0x38] sm:$0xff]  ;;  %v333_v24 = vld [vmem:[%s2055_s6 + $0x20] sm:$0xff] }
  0x1e   : > { %1538 = vmatprep.subr.bf16.mxu0 %v1537_v28  ;;  %v1557_v23 = vpack.c.bf16 %v336_v22, %v334_v21  ;;  %v338_v30 = vld [vmem:[%s2055_s6 + $0x48] sm:$0xf]  ;;  %v337_v32 = vld [vmem:[%s2055_s6 + $0x40] sm:$0xf] }
  0x21   : > { %1540 = vmatpush3.bf16.msra.mxu0 %v1539_v33 }
  0x22   : > { %1542 = vmatprep.subr.bf16.mxu0 %v1541_v34 }
  0x25   : > { %1544 = vmatpush3.bf16.msra.mxu0 %v1543_v39  ;;  %v328_v39 = vld [vmem:[%s2054_s5] sm:$0xf] }
  0x26   : > { %1546 = vmatprep.subr.bf16.mxu0 %v1545_v40 }
  0x29   : > { %1548 = vmatpush3.bf16.msra.mxu0 %v1547_v45 }
  0x2a   : > { %1550 = vmatprep.subr.bf16.mxu0 %v1549_v46 }
  0x2d   : > { %1552 = vmatpush3.bf16.msra.mxu0 %v1551_v49 }
  0x2e   : > { %1471 = vmatprep.subr.mxu0 %v1678_v50 }
  0x30   : > { %408 = vmatmul.mubr.f32.vlgmr.msra.gmra.mrb[0].mxu0 %v339_v25  ;;  %v335_v25 = vld [vmem:[%s2055_s6 + $0x30] sm:$0xff] }
  0x31   : > { %1473 = vmatprep.mubr.msk.f32.mxu0 %vm1679_vm0, %v1678_v50  ;;  %v1559_v27 = vpack.c.bf16 %v335_v25, %v333_v24 }
  0x97   : > { %v416_v57 = vpop.permute.xlu0 %415 }
 0x103   : > { %v1448_v53 = vpop.f32.mrb[0].mxu0 }
 0x104   : > { %v1449_v54 = vpop.f32.mrb[1].mxu0 }
 0x105   : > { %v1450_v55 = vadd.f32 %v1449_v54, %v1448_v53 }
 0x107   : > { %1472 = vmatpush3.msk.msra.mxu0 %vm422_vm1, %v1450_v55 }
 0x108   : > { %1474 = vmatmul.mubr.msk.f32.vlgmr.msra.gmra.mrb[2].mxu0 %vm418_vm2, %v309_v56  ;;  %1516 = vmatprep.subr.mxu0 %v1678_v50 }
 0x109   : > { %1518 = vmatprep.mubr.msk.f32.mxu0 %vm1679_vm0, %v1678_v50 }
 0x1db   : > { %v492_v58 = vpop.f32.mrb[2].mxu0 }
 0x1dc   : > { %v493_v59 = vadd.f32 %v492_v58, %v416_v57  ;;  %v1475_v60 = vpop.f32.mrb[3].mxu0 }
 0x1de   : > { %v496_v61 = vmax.f32 %v493_v59, 0.0 }
 0x1e0   : > { %1477 = vmatpush3.msk.msra.mxu1 %vm422_vm1, %v496_v61  ;;  %1517 = vmatpush3.msk.msra.mxu0 %vm422_vm1, %v496_v61 }
 0x1e1   : > { %1479 = vmatmul.mubr.msk.f32.vlgmr.msra.gmra.mrb[0].mxu1 %vm418_vm2, %v311_v62  ;;  %1481 = vmatprep.subr.mxu1 %v1678_v50 }
 0x1e2   : > { %1482 = vmatpush3.msk.msra.mxu1 %vm422_vm1, %v496_v61  ;;  %1483 = vmatprep.mubr.msk.f32.mxu1 %vm1679_vm0, %v1678_v50 }
 0x1e3   : > { %1486 = vmatprep.subr.mxu1 %v1678_v50  ;;  %1519 = vmatmul.mubr.msk.f32.vlgmr.msra.gmra.mrb[4].mxu0 %vm418_vm2, %v1385_v63 }
 0x1e5   : > { %1484 = vmatmul.mubr.msk.f32.vlgmr.msra.gmra.mrb[2].mxu1 %vm418_vm2, %v1378_v0 }
 0x1e6   : > { %1487 = vmatpush3.msk.msra.mxu1 %vm422_vm1, %v496_v61  ;;  %1488 = vmatprep.mubr.msk.f32.mxu1 %vm1679_vm0, %v1678_v50 }
 0x1e7   : > { %1491 = vmatprep.subr.mxu1 %v1678_v50 }
 0x1e9   : > { %1489 = vmatmul.mubr.msk.f32.vlgmr.msra.gmra.mrb[4].mxu1 %vm418_vm2, %v1379_v1 }
 0x1ea   : > { %1492 = vmatpush3.msk.msra.mxu1 %vm422_vm1, %v496_v61  ;;  %1493 = vmatprep.mubr.msk.f32.mxu1 %vm1679_vm0, %v1678_v50 }
 0x1eb   : > { %1496 = vmatprep.subr.mxu1 %v1678_v50 }
 0x1ed   : > { %1494 = vmatmul.mubr.msk.f32.vlgmr.msra.gmra.mrb[6].mxu1 %vm418_vm2, %v1380_v2 }
 0x1ee   : > { %1497 = vmatpush3.msk.msra.mxu1 %vm422_vm1, %v496_v61  ;;  %1498 = vmatprep.mubr.msk.f32.mxu1 %vm1679_vm0, %v1678_v50 }
 0x1ef   : > { %1501 = vmatprep.subr.mxu1 %v1678_v50 }
 0x1f1   : > { %1499 = vmatmul.mubr.msk.f32.vlgmr.msra.gmra.mrb[8].mxu1 %vm418_vm2, %v1381_v3 }
 0x1f2   : > { %1502 = vmatpush3.msk.msra.mxu1 %vm422_vm1, %v496_v61  ;;  %1503 = vmatprep.mubr.msk.f32.mxu1 %vm1679_vm0, %v1678_v50 }
 0x1f3   : > { %1506 = vmatprep.subr.mxu1 %v1678_v50 }
 0x1f5   : > { %1504 = vmatmul.mubr.msk.f32.vlgmr.msra.gmra.mrb[10].mxu1 %vm418_vm2, %v1382_v4 }
 0x1f6   : > { %1507 = vmatpush3.msk.msra.mxu1 %vm422_vm1, %v496_v61  ;;  %1508 = vmatprep.mubr.msk.f32.mxu1 %vm1679_vm0, %v1678_v50 }
 0x1f7   : > { %1511 = vmatprep.subr.mxu1 %v1678_v50 }
 0x1f9   : > { %1509 = vmatmul.mubr.msk.f32.vlgmr.msra.gmra.mrb[12].mxu1 %vm418_vm2, %v1383_v5 }
 0x1fa   : > { %1512 = vmatpush3.msk.msra.mxu1 %vm422_vm1, %v496_v61  ;;  %1513 = vmatprep.mubr.msk.f32.mxu1 %vm1679_vm0, %v1678_v50 }
 0x1fb   : > { %1554 = vmatprep.subr.bf16.mxu1 %v1553_v15 }
 0x1fd   : > { %1514 = vmatmul.mubr.msk.f32.vlgmr.msra.gmra.mrb[14].mxu1 %vm418_vm2, %v1384_v6 }
 0x1fe   : > { %1283 = vmatprep.mubr.f32.mxu1 %v1678_v50  ;;  %1556 = vmatpush1.bf16.msra.mxu1 %v1555_v19 }
 0x1ff   : > { %1558 = vmatprep.subr.bf16.mxu1 %v1557_v23 }
 0x202   : > { %1560 = vmatpush1.bf16.msra.mxu1 %v1559_v27 }
 0x203   : > { %1406 = vmatprep.subr.msk.mxu1 %vm422_vm1, %v338_v30 }
 0x206   : > { %1407 = vmatpush1.msk.msra.mxu1 %vm422_vm1, %v337_v32 }
 0x2b4   : > { %v1963_v7 = vpop.f32.mrb[0].mxu1 }
 0x2b5   : > { %v1480_v8 = vpop.f32.mrb[1].mxu1 }
 0x2b6   : > { %v1153_v9 = vpop.f32.mrb[4].mxu0 }
 0x2b7   : > { %v1520_v10 = vpop.f32.mrb[5].mxu0 }
 0x2b8   : > { %v642_v11 = vpop.f32.mrb[2].mxu1 }
 0x2b9   : > { %1158 = vrot.lane.b32.xlu0 %v642_v11, %s1681_s21  ;;  %v1485_v12 = vpop.f32.mrb[3].mxu1 }
 0x2bc   : > { %v715_v18 = vpop.f32.mrb[4].mxu1 }
 0x2bd   : > { %1162 = vrot.lane.b32.xlu1 %v715_v18, %s1682_s15  ;;  %v1490_v20 = vpop.f32.mrb[5].mxu1 }
 0x2c0   : > { %v788_v26 = vpop.f32.mrb[6].mxu1 }
 0x2c1   : > { %1166 = vrot.lane.b32.xlu1 %v788_v26, %s1683_s8  ;;  %v1495_v28 = vpop.f32.mrb[7].mxu1  ;;  %s1415_s8 = sshll.u32 %s1751_s28, 7  ;;  %s1689_s28 = smov [#allocation2]  }
 0x2c2   : > { %s2007_s15 = scalar_lea.hbm %s2056_s7, %s1415_s8 }
 0x2c4   : > { %v861_v29 = vpop.f32.mrb[8].mxu1 }
 0x2c5   : > { %1170 = vrot.lane.b32.xlu0 %v861_v29, %s1684_s13  ;;  %v1500_v31 = vpop.f32.mrb[9].mxu1 }
 0x2c8   : > { %v934_v33 = vpop.f32.mrb[10].mxu1 }
 0x2c9   : > { %1174 = vrot.lane.b32.xlu1 %v934_v33, %s1685_s16  ;;  %v1505_v34 = vpop.f32.mrb[11].mxu1  ;;  %s1298_s16 = scalar_lea.sflag [#allocation3], %s269_s23 }
 0x2cc   : > { %v1007_v35 = vpop.f32.mrb[12].mxu1 }
 0x2cd   : > { %1178 = vrot.lane.b32.xlu0 %v1007_v35, %s1686_s18  ;;  %v1510_v36 = vpop.f32.mrb[13].mxu1  ;;  %s1614_s18 = scalar_lea.vmem %s2009_s20, 128 }
 0x2ce   : > { %p1615_p11 = scmp.ne.s32.totalorder %s2009_s20, %s1614_s18 }
 0x2d0   : > { %v1080_v37 = vpop.f32.mrb[14].mxu1  ;;  %p1616_p12 = pnand %p1615_p11, %p1768_p5 }
 0x2d1   : > { %1182 = vrot.lane.b32.xlu1 %v1080_v37, %s1687_s19  ;;  %1186 = vrot.lane.b32.xlu0 %v1153_v9, %s1688_s17  ;;  %v1515_v38 = vpop.f32.mrb[15].mxu1  ;;  %s1618_s19 = sshll.u32 %s1689_s28, 4  ;;  %s1619_s19 = int_to_ptr.vmem [resolvable:$false] %s1618_s19 }
 0x2d2   : > { %p1617_p13 = pneg %p1616_p12  ;;  %s1620_s17 = scalar_lea.vmem %s1619_s19, 256 }
 0x2d3   : > { %p1621_p0 = scmp.lt.s32.totalorder %s2009_s20, %s1619_s19  ;;  %p1622_p1 = scmp.lt.s32.totalorder %s1620_s17, %s1614_s18 }
 0x2d5   : > { %1206 = vperm.xlu1 %1612, %v328_v39   ;;  %p1623_p2 = por %p1622_p1, %p1621_p0 }
 0x2d7   : > { %p1624_p3 = pnand %p1623_p2, %p1617_p13 }
 0x32b   : > { %v1159_v41 = vpop.permute.xlu0 %1158 }
 0x32c   : > { %v1189_v44 = vsel %vm418_vm2, %v1963_v7, %v1159_v41 }
 0x32f   : > { %v1163_v40 = vpop.permute.xlu1 %1162 }
 0x330   : > { %v1191_v45 = vsel %vm1190_vm3, %v1189_v44, %v1163_v40 }
 0x333   : > { %v1167_v42 = vpop.permute.xlu1 %1166 }
 0x334   : > { %v1193_v48 = vsel %vm1192_vm4, %v1191_v45, %v1167_v42 }
 0x337   : > { %v1171_v43 = vpop.permute.xlu0 %1170 }
 0x338   : > { %v1195_v49 = vsel %vm1194_vm5, %v1193_v48, %v1171_v43 }
 0x33b   : > { %v1175_v46 = vpop.permute.xlu1 %1174 }
 0x33c   : > { %v1197_v50 = vsel %vm1196_vm6, %v1195_v49, %v1175_v46 }
 0x33f   : > { %v1179_v47 = vpop.permute.xlu0 %1178 }
 0x340   : > { %v1199_v51 = vsel %vm1198_vm7, %v1197_v50, %v1179_v47 }
 0x343   : > { %v1183_v52 = vpop.permute.xlu1 %1182  ;;  %v1187_v53 = vpop.permute.xlu0 %1186 }
 0x344   : > { %v1201_v54 = vsel %vm1200_vm8, %v1199_v51, %v1183_v52 }
 0x345   : > { %v1203_v55 = vsel %vm1202_vm9, %v1201_v54, %v1187_v53 }
 0x346   : > { %1408 = vmatmul.mubr.msk.f32.vlgmr.msra.gmra.mrb[16].mxu1 %vm1209_vm10, %v1203_v55 }
 0x354   : > { %v1207_v56 = vpop.permute.xlu1 %1206 }
 0x419   : > { %v1285_v57 = vpop.f32.mrb[16].mxu1 }
 0x41a   : > { %v1286_v58 = vadd.f32 %v1285_v57, %v1207_v56  ;;  %v1287_v59 = vpop.f32.mrb[17].mxu1 }
 0x41b   : > { %v1288_v60 = vadd.f32 %v1287_v59, %v1207_v56 }
 0x41c   : > { %v1290_v61 = vmax.f32 %v1286_v58, 0.0 }
 0x41d   : > { %v1291_v62 = vmax.f32 %v1288_v60, 0.0 }
 0x41f   : > { %v1294_v63 = vcombine.low %v1290_v61, %v1291_v62 }
 0x421   : > { %1296 = vst [vmem:[%s271_s9] sm:$0xff] %v1294_v63 }
 0x422   : > { %1627 = shalt.err (!%p1624_p3)
}
 0x423   : > { %s1628_s21 = scalar_lea.hbm %s2007_s15, 128  ;;  %s1632_s29 = scalar_lea.hbm %s2056_s7, 256 }
 0x424   : > { %p1629_p4 = scmp.ne.s32.totalorder %s2007_s15, %s1628_s21  ;;  %p1633_p9 = scmp.lt.u32.totalorder %s2007_s15, %s2056_s7 }
 0x425   : > { %p1634_p10 = scmp.lt.u32.totalorder %s1632_s29, %s1628_s21  ;;  %p1636_p12 = scmp.lt.u32.totalorder %s1628_s21, %s2007_s15 }
 0x426   : > { %p1630_p7 = pnand %p1629_p4, %p1768_p5 }
 0x427   : > { %p1635_p11 = por %p1634_p10, %p1633_p9 }
 0x428   : > { %p1631_p8 = pneg %p1630_p7 }
 0x429   : > { %p1637_p13 = por %p1636_p12, %p1635_p11 }
 0x42b   : > { %p1638_p0 = pnand %p1637_p13, %p1631_p8 }
 0x42d   : > { %1641 = shalt.err (!%p1638_p0)
}
 0x42e   : > { %1561 = dma.vmem_to_hbm [thread:$0]  (%p1768_p5), %s2009_s20, 128, %s2007_s15, %s1298_s16  }
 0x42f PF: > { %p1567_p1 = scmp.ge.s32.totalorder %s1676_s27, 2  ;;  %s1324_s13 = sand.u32 1, %s1664_s24  }
 0x430   : > { %s1325_s14 = scalar_lea.sflag [#allocation3], %s1324_s13 }
 0x431   : > { %p1564_p2 = pnand %p1567_p1, %p1772_p6 }
 0x433   : > { %1659 = dma.done.wait (!%p1564_p2), %s1325_s14, 128  }
 0x434   : > { %1661 = vsyncadd (!%p1564_p2), %s1325_s14, 4294967168  ;;  %p17_p3 = scmp.ge.s32.totalorder %s1755_s30, 4   ;;  %s2059_s24 = smov %s1668_s25 }
 0x435   : > { %s2060_s25 = smov %s1672_s26  ;;  %s2061_s26 = smov %s1766_s10 }
 0x436   : > { %s2062_s27 = smov %s1755_s30  ;;  %19 = sbr.rel (!%p17_p3) target bundleno = 3 (0x3), region = 91 }
 0x43d   :  { %1330 = vsyncpa [#allocation3], 1 }
 0x43e   :  { %1332 = vsyncpa [#allocation3 + $0x1], 1 }

</bundles_post_ra>
